<compile_context>
chip_gen: v7x
topology: tpu7x:2x2x1
jax: 0.10.0
libtpu: 0.0.40
codegen_flags: <defaults>
</compile_context>

<pallas_src>
import functools
import math

import jax
import jax.numpy as jnp
from jax.experimental import pallas as pl
from jax.experimental.pallas import tpu as pltpu

EPS = 1e-16  # Reference computes -sum p*log(p + eps); with eps=1e-16 the difference from
             # -sum p*log(p) is below f32 resolution, so the kernel uses the logZ form.


def _round_up(x, m):
    return ((x + m - 1) // m) * m


def _largest_divisor_leq(n, cap):
    cap = max(1, min(int(cap), int(n)))
    for d in range(cap, 0, -1):
        if n % d == 0:
            return d
    return 1


def _vmem_capacity_bytes():
    """Physical VMEM per TensorCore (128 MiB on v5e/v6e, 64 MiB on v7x); safe fallback."""
    try:
        cap = getattr(pltpu.get_tpu_info(), "vmem_capacity_bytes", None)
        if cap:
            return int(cap)
    except Exception:
        pass
    return 64 << 20


def _entropy_kernel(x_ref, out_ref, *, spatial_size, tile_lanes, tiles_per_chunk,
                    needs_mask, use_approx_recip):
    """x_ref:   (Bb, C, TS) input tile (Bb batch rows, all channels, TS pixels).
       out_ref: (1, 1, TS)  lane-dense f32 accumulator, resident across grid axis 2."""
    t = pl.program_id(2)

    @pl.when(t == 0)
    def _init():
        out_ref[...] = jnp.zeros_like(out_ref)

    x = x_ref[...].astype(jnp.float32)                       # (Bb, C, TS)

    def tile_entropy(xv):
        # Numerically stable softmax entropy via logZ:
        #   H = log Z - (sum_c ex*(x-m)) / Z,  ex = exp(x-m),  Z = sum_c ex
        # -> one exp per element, one log (+ one divide / approx recip) per pixel.
        m = jnp.max(xv, axis=1, keepdims=True)               # (Bb, 1, TS)
        xs = xv - m
        ex = jnp.exp(xs)
        z = jnp.sum(ex, axis=1, keepdims=True)               # (Bb, 1, TS)
        sxe = jnp.sum(ex * xs, axis=1, keepdims=True)        # (Bb, 1, TS)
        if use_approx_recip:
            return jnp.log(z) - sxe * pl.reciprocal(z, approx=True)
        return jnp.log(z) - sxe / z                          # (Bb, 1, TS)

    if needs_mask:
        c = pl.program_id(1)
        tile_start = (c * tiles_per_chunk + t) * tile_lanes
        is_edge = tile_start + tile_lanes > spatial_size     # partial or duplicate tile

        @pl.when(is_edge)
        def _edge():
            # Zero padded lanes BEFORE the exp (keep garbage out of the math) and
            # drop their entropy contribution afterwards.
            lane = jax.lax.broadcasted_iota(jnp.int32, (1, 1, tile_lanes), 2)
            valid = (tile_start + lane) < spatial_size
            ent = tile_entropy(jnp.where(valid, x, 0.0))
            ent = jnp.where(valid, ent, 0.0)
            out_ref[...] += jnp.sum(ent, axis=0)[None]

        @pl.when(jnp.logical_not(is_edge))
        def _interior():
            out_ref[...] += jnp.sum(tile_entropy(x), axis=0)[None]
    else:
        out_ref[...] += jnp.sum(tile_entropy(x), axis=0)[None]


def _plan(B, C, S, itemsize, vmem_target_bytes):
    """Pick (Bb, TS, num_bb, num_tiles, NC, T, vmem_limit) from a per-TC VMEM budget."""
    vmem_cap = _vmem_capacity_bytes()
    if vmem_target_bytes is None:
        # Budget for the double-buffered input + accumulator blocks, per TensorCore.
        vmem_target = max(8 << 20, min(int(vmem_cap * 0.55), 48 << 20))
    else:
        vmem_target = int(vmem_target_bytes)

    # VMEM bytes per pixel per batch row: the channel column pads to the native
    # (8,128)/f32 or (16,128)/bf16 tile, i.e. C*itemsize rounded up to 32 bytes.
    cbytes = _round_up(C * itemsize, 32)
    out_lane_bytes = 32                 # (1, TS) f32 accumulator pads to 8 sublanes

    if 2 * (cbytes + out_lane_bytes) * S <= vmem_target:
        # A full spatial row fits comfortably: keep TS = S, pack batch rows instead.
        TS = S
        bb_budget = max(1, (vmem_target - 2 * out_lane_bytes * S) // (2 * cbytes * S))
        bb_cap = max(1, min(bb_budget, B // 4))    # keep several grid steps for pipelining / 2 TCs
        Bb = _largest_divisor_leq(B, bb_cap)
    else:
        # Tile the spatial axis; TS must be a multiple of 128 when TS < S.
        Bb = 1
        max_lanes = max(1, vmem_target // (2 * (cbytes + out_lane_bytes)))
        TS = max(128, (max_lanes // 128) * 128)
        TS = min(TS, S)
        # TODO(synk): channel tiling (online max/sum) for very large C where even
        #             TS=128 exceeds the budget; for now vmem_limit is raised below.

    num_bb = B // Bb
    num_tiles = -(-S // TS)

    # Split the tiled spatial reduction across two parallel chunks when there is no
    # batch parallelism (B == 1), so both v7x TensorCores run.
    NC = 2 if (num_bb == 1 and num_tiles >= 2) else 1
    T = -(-num_tiles // NC)

    used = 2 * (Bb * cbytes + out_lane_bytes) * TS           # both pipeline buffers
    vmem_limit = min(int(vmem_cap * 0.9), used + (8 << 20))
    vmem_limit = max(vmem_limit, used + (2 << 20))

    return Bb, TS, num_bb, num_tiles, NC, T, vmem_limit


def entropy(x, *, vmem_target_bytes=None):
    """Pallas equivalent of Entropy(reduce=True).forward(x) for (B, C, *spatial) input.

    `vmem_target_bytes` is a test/tuning override for the VMEM block budget.
    """
    # TODO(synk): reduce=False path (returning the per-pixel (B, *spatial) entropy map)
    #             not implemented; this mirrors the module default reduce=True.
    assert x.ndim >= 2, "Entropy expects (B, C, *spatial)"
    B, C = int(x.shape[0]), int(x.shape[1])
    S = int(math.prod(x.shape[2:])) if x.ndim > 2 else 1
    xr = x.reshape(B, C, S)
    itemsize = jnp.dtype(x.dtype).itemsize

    Bb, TS, num_bb, num_tiles, NC, T, vmem_limit = _plan(B, C, S, itemsize, vmem_target_bytes)
    needs_mask = (S % TS != 0) or (NC * T > num_tiles)
    use_approx_recip = x.dtype == jnp.bfloat16   # protects the single EUP on v7x

    kernel = functools.partial(
        _entropy_kernel,
        spatial_size=S, tile_lanes=TS, tiles_per_chunk=T,
        needs_mask=needs_mask, use_approx_recip=use_approx_recip,
    )

    last_tile = num_tiles - 1
    if NC * T > num_tiles:
        # Keep the duplicate (past-the-end) tiles in bounds; the kernel masks them to 0.
        in_idx = lambda bb, c, t: (bb, 0, jnp.minimum(c * T + t, last_tile))
    else:
        in_idx = lambda bb, c, t: (bb, 0, c * T + t)
    out_idx = lambda bb, c, t: (bb * NC + c, 0, 0)

    cost = pl.CostEstimate(
        flops=int(6 * B * C * S),
        transcendentals=int(B * C * S + 2 * B * S),
        bytes_accessed=int(B * C * S * itemsize + num_bb * NC * TS * 4),
    )

    partial = pl.pallas_call(
        kernel,
        out_shape=jax.ShapeDtypeStruct((num_bb * NC, 1, TS), jnp.float32),
        grid=(num_bb, NC, T),
        in_specs=[pl.BlockSpec((Bb, C, TS), in_idx)],
        out_specs=pl.BlockSpec((1, 1, TS), out_idx),
        compiler_params=pltpu.CompilerParams(
            dimension_semantics=("parallel", "parallel", "arbitrary"),
            vmem_limit_bytes=int(vmem_limit),
        ),
        cost_estimate=cost,
    )(xr)

    # Final cross-lane / cross-block reduction and mean in the wrapper (cheap).
    return jnp.sum(partial) / jnp.float32(B * S)


def entropy_ref(x):
    """Pure-JAX reference matching the PyTorch forward (reduce=True)."""
    p = jax.nn.softmax(x.astype(jnp.float32), axis=1)
    e = -(p * jnp.log(p + EPS)).sum(axis=1)
    return e.mean()


def _check(x, **kw):
    out = entropy(x, **kw)
    jax.block_until_ready(out)
    ref = entropy_ref(x)
    assert jnp.allclose(out, ref, rtol=1e-5, atol=1e-5), (float(out), float(ref))
    return out


if __name__ == "__main__":
    key = jax.random.PRNGKey(0)

    # Main case matching the PyTorch module's NCHW usage.
    x = jax.random.normal(key, (2, 4, 16, 16), dtype=jnp.float32)
    _check(x)

    k1, k2, k3 = jax.random.split(key, 3)

    # Batch-blocked path: several batch rows packed into one block.
    _check(jax.random.normal(k1, (8, 4, 8, 8), dtype=jnp.float32))

    # Spatial tiling + two parallel chunks + masked partial edge tile
    # (tiny budget override forces tiling at small shapes).
    _check(jax.random.normal(k2, (1, 4, 36, 40), dtype=jnp.float32),
           vmem_target_bytes=96 << 10)

    # Duplicate-tile path: odd tile count split across the two chunks.
    _check(jax.random.normal(k3, (1, 4, 36, 40), dtype=jnp.float32),
           vmem_target_bytes=72 << 10)

    print("KERNEL_OK")
</pallas_src>

<mosaic_0001>
module attributes {stable_mosaic.version = 11 : i64} {
  func.func @_entropy_kernel(%arg0: i32, %arg1: i32, %arg2: i32, %arg3: memref<1x4x256xf32, #tpu.memory_space<vmem>>, %arg4: memref<1x1x256xf32, #tpu.memory_space<vmem>>) attributes {dimension_semantics = [#tpu.dimension_semantics<parallel>, #tpu.dimension_semantics<parallel>, #tpu.dimension_semantics<arbitrary>], iteration_bounds = array<i64: 2, 1, 1>, scalar_prefetch = 0 : i64, scratch_operands = 0 : i64, tpu.core_type = #tpu.core_type<tc>, window_params = [{transform_indices = @transform_0, window_bounds = array<i64: 1, 4, 256>}, {transform_indices = @transform_1, window_bounds = array<i64: 1, 1, 256>}]} {
    %c0_i32 = arith.constant 0 : i32
    %0 = arith.cmpi eq, %arg2, %c0_i32 : i32
    %1 = arith.extui %0 : i1 to i32
    %c0_i32_0 = arith.constant 0 : i32
    %2 = arith.cmpi ne, %1, %c0_i32_0 : i32
    scf.if %2 {
      %cst_12 = arith.constant 0.000000e+00 : f32
      %22 = vector.broadcast %cst_12 : f32 to vector<1x1x256xf32>
      %c0_13 = arith.constant 0 : index
      %c0_14 = arith.constant 0 : index
      %c0_15 = arith.constant 0 : index
      %23 = vector.load %arg4[%c0_13, %c0_14, %c0_15] : memref<1x1x256xf32, #tpu.memory_space<vmem>>, vector<1x1x256xf32>
      tpu.vector_store %arg4[%c0_13, %c0_14, %c0_15], %22 {strides = array<i32>} : memref<1x1x256xf32, #tpu.memory_space<vmem>>, vector<1x1x256xf32>,
    } else {
    }
    %c0 = arith.constant 0 : index
    %c0_1 = arith.constant 0 : index
    %c0_2 = arith.constant 0 : index
    %3 = vector.load %arg3[%c0, %c0_1, %c0_2] : memref<1x4x256xf32, #tpu.memory_space<vmem>>, vector<1x4x256xf32>
    %c0_3 = arith.constant 0 : index
    %c0_4 = arith.constant 0 : index
    %c0_5 = arith.constant 0 : index
    %4 = vector.load %arg4[%c0_3, %c0_4, %c0_5] : memref<1x1x256xf32, #tpu.memory_space<vmem>>, vector<1x1x256xf32>
    %cst = arith.constant dense<0xFF800000> : vector<1x256xf32>
    %5 = vector.multi_reduction <maximumf>, %3, %cst [1] : vector<1x4x256xf32> to vector<1x256xf32>
    %6 = vector.shape_cast %5 : vector<1x256xf32> to vector<1x1x256xf32>
    %7 = vector.broadcast %6 : vector<1x1x256xf32> to vector<1x4x256xf32>
    %8 = arith.subf %3, %7 : vector<1x4x256xf32>
    %9 = math.exp %8 : vector<1x4x256xf32>
    %cst_6 = arith.constant dense<0.000000e+00> : vector<1x256xf32>
    %10 = vector.multi_reduction <add>, %9, %cst_6 [1] : vector<1x4x256xf32> to vector<1x256xf32>
    %11 = vector.shape_cast %10 : vector<1x256xf32> to vector<1x1x256xf32>
    %12 = arith.mulf %9, %8 : vector<1x4x256xf32>
    %cst_7 = arith.constant dense<0.000000e+00> : vector<1x256xf32>
    %13 = vector.multi_reduction <add>, %12, %cst_7 [1] : vector<1x4x256xf32> to vector<1x256xf32>
    %14 = vector.shape_cast %13 : vector<1x256xf32> to vector<1x1x256xf32>
    %15 = math.log %11 : vector<1x1x256xf32>
    %16 = arith.divf %14, %11 : vector<1x1x256xf32>
    %17 = arith.subf %15, %16 : vector<1x1x256xf32>
    %cst_8 = arith.constant dense<0.000000e+00> : vector<1x256xf32>
    %18 = vector.multi_reduction <add>, %17, %cst_8 [0] : vector<1x1x256xf32> to vector<1x256xf32>
    %19 = vector.shape_cast %18 : vector<1x256xf32> to vector<1x1x256xf32>
    %20 = arith.addf %4, %19 : vector<1x1x256xf32>
    %c0_9 = arith.constant 0 : index
    %c0_10 = arith.constant 0 : index
    %c0_11 = arith.constant 0 : index
    %21 = vector.load %arg4[%c0_9, %c0_10, %c0_11] : memref<1x1x256xf32, #tpu.memory_space<vmem>>, vector<1x1x256xf32>
    tpu.vector_store %arg4[%c0_9, %c0_10, %c0_11], %20 {strides = array<i32>} : memref<1x1x256xf32, #tpu.memory_space<vmem>>, vector<1x1x256xf32>,
    return
  }
  func.func @transform_0(%arg0: i32, %arg1: i32, %arg2: i32) -> (i32, i32, i32) {
    %c1_i32 = arith.constant 1 : i32
    %0 = arith.muli %arg1, %c1_i32 : i32
    %1 = arith.addi %0, %arg2 : i32
    %c0_i32 = arith.constant 0 : i32
    %c0_i32_0 = arith.constant 0 : i32
    return %arg0, %c0_i32, %1 : i32, i32, i32
  }
  func.func @transform_1(%arg0: i32, %arg1: i32, %arg2: i32) -> (i32, i32, i32) {
    %c1_i32 = arith.constant 1 : i32
    %0 = arith.muli %arg0, %c1_i32 : i32
    %1 = arith.addi %0, %arg1 : i32
    %c0_i32 = arith.constant 0 : i32
    %c0_i32_0 = arith.constant 0 : i32
    %c0_i32_1 = arith.constant 0 : i32
    return %1, %c0_i32, %c0_i32_0 : i32, i32, i32
  }
}

</mosaic_0001>

<bundles_post_ra>
// kernel: tpu_custom_call.1
= control target key start
LH: loop header
LB: loop body
LE: loop exit
PB: predicated region body
PF: predicated region fallthrough
CT: control target
= control target key end

     0   :  { %6 = vsyncpa [#allocation3], 0  ;;  %s788_s0 = inlined_call_operand.hbm [shape: f32[2,4,256], index: 0, kind: input, shape index: {}]   ;;  %s789_s1 = inlined_call_operand.hbm [shape: f32[2,1,256], index: 1, kind: output, shape index: {}]  }
   0x1   :  { %8 = vsyncpa [#allocation3 + $0x1], 0 }
   0x2   :  { %9 = vsyncpa [#allocation4], 0 }
   0x3   :  { %11 = vsyncpa [#allocation4 + $0x1], 0  ;;  %s593_s6 = smov 0   ;;  %s595_s7 = smov 0  }
   0x4   :  { %s597_s8 = smov 0   ;;  %s599_s9 = smov 0  }
   0x5   :  { %s601_s10 = smov 0   ;;  %s603_s11 = smov 0  }
   0x6 LB: > { %s373_s12 = sadd.s32 4294967295, %s577_s11   ;;  %s374_s13 = sadd.s32 4294967294, %s577_s11   ;;  %s577_s11 = sphi %s603_s11, %s17_s11   ;;  %s573_s10 = sphi %s601_s10, %s807_s10   ;;  %s569_s9 = sphi %s599_s9, %s806_s9   ;;  %s565_s8 = sphi %s597_s8, %s805_s8   ;;  %s561_s7 = sphi %s595_s7, %s804_s7   ;;  %s557_s6 = sphi %s593_s6, %s803_s6  }
   0x7   : > { %s36_s14 = sadd.s32 1, %s573_s10  ;;  %s47_s15 = sadd.s32 1, %s565_s8 }
   0x8   : > { %p38_p0 = scmp.ge.s32.totalorder %s36_s14, 2  ;;  %p54_p1 = scmp.ne.s32.totalorder %s565_s8, %s561_s7 }
   0x9   : > { %p55_p2 = scmp.eq.s32.totalorder %s577_s11, 0  ;;  %p60_p3 = scmp.ne.s32.totalorder %s561_s7, %s557_s6 }
   0xa   : > { %s809_s14 = smov (%p38_p0, %s36_s14), 0  ;;  %p61_p5 = scmp.eq.s32.totalorder %s373_s12, 0 }
   0xb   : > { %p634_p4 = por %p55_p2, %p54_p1  ;;  %s42_s17 = ssub.s32 %s573_s10, %s809_s14 }
   0xc   : > { %p86_p6 = scmp.eq.s32.totalorder %s373_s12, 1  ;;  %p45_p7 = scmp.eq.s32.totalorder %s42_s17, 0 }
   0xd   : > { %p640_p8 = por %p61_p5, %p60_p3  ;;  %p92_p10 = scmp.eq.s32.totalorder %s374_s13, 1 }
   0xe   : > { %p644_p9 = por %p86_p6, %p54_p1  ;;  %p402_p13 = scmp.lt.s32.totalorder %s577_s11, 2 }
   0xf   : > { %s649_s20 = scalar_select %p45_p7, %s565_s8, %s47_s15  }
  0x10   : > { %s793_s19 = scalar_select %p644_p9, 1, 0 }
  0x11   : > { %p651_p11 = por %p92_p10, %p60_p3  ;;  %s112_s22 = sand.u32 1, %s565_s8  }
  0x12   : > { %s377_s23 = sshll.u32 %s112_s22, 3  ;;  %s388_s24 = sshll.u32 %s573_s10, 7 }
  0x13   : > { %s794_s21 = scalar_select %p651_p11, 1, 0 }
  0x14   : > { %s662_s27 = scalar_lea.hbm %s788_s0, %s388_s24  ;;  %s116_s28 = scalar_lea.vmem [#allocation2], %s377_s23 }
  0x15   : > { %s127_s29 = sshll.u32 %s116_s28, 4  ;;  %p668_p0 = pnand %p402_p13, %p634_p4  ;;  %s664_s29 = int_to_ptr.vmem [resolvable:$true] %s127_s29 }
  0x16   : > { %s113_s2 = scalar_lea.sflag [#allocation3], %s112_s22  ;;  %s465_s3 = scalar_lea.hbm %s662_s27, 128 }
  0x17   : > { %p466_p3 = scmp.ne.s32.totalorder %s662_s27, %s465_s3  ;;  %p467_p5 = pneg %p668_p0 }
  0x18   : > { %s470_s12 = scalar_lea.hbm %s788_s0, 256  ;;  %p471_p4 = scmp.lt.u32.totalorder %s662_s27, %s788_s0 }
  0x19   : > { %p468_p6 = pnand %p467_p5, %p466_p3  ;;  %p472_p10 = scmp.lt.u32.totalorder %s470_s12, %s465_s3 }
  0x1a   : > { %p474_p12 = scmp.lt.u32.totalorder %s465_s3, %s662_s27 }
  0x1b   : > { %p469_p7 = pneg %p468_p6  ;;  %p473_p13 = por %p472_p10, %p471_p4 }
  0x1d   : > { %p475_p1 = por %p474_p12, %p473_p13 }
  0x1f   : > { %p476_p2 = pnand %p475_p1, %p469_p7 }
  0x21   : > { %479 = shalt.err (!%p476_p2)
}
  0x22   : > { %s480_s16 = scalar_lea.vmem %s664_s29, 128  ;;  %s579_s17 = smov [#allocation2]  }
  0x23   : > { %p481_p3 = scmp.ne.s32.totalorder %s664_s29, %s480_s16  ;;  %s485_s22 = sshll.u32 %s579_s17, 4  ;;  %s486_s22 = int_to_ptr.vmem [resolvable:$false] %s485_s22 }
  0x24   : > { %s487_s23 = scalar_lea.vmem %s486_s22, 256  ;;  %p488_p9 = scmp.lt.s32.totalorder %s664_s29, %s486_s22 }
  0x25   : > { %p483_p6 = pnand %p481_p3, %p467_p5  ;;  %p489_p4 = scmp.lt.s32.totalorder %s487_s23, %s480_s16 }
  0x27   : > { %p484_p11 = pneg %p483_p6  ;;  %p490_p10 = por %p489_p4, %p488_p9 }
  0x29   : > { %p491_p12 = pnand %p490_p10, %p484_p11 }
  0x2b   : > { %494 = shalt.err (!%p491_p12)
}
  0x2c   : > { %397 = dma.hbm_to_vmem [thread:$0]  (!%p668_p0), %s662_s27, 128, %s664_s29, %s113_s2  }
  0x2d   : > { %p796_p1 = scmp.lt.s32.totalorder %s577_s11, 3  ;;  %p797_p2 = scmp.ge.s32.totalorder %s577_s11, 1 }
  0x2f   : > { %p133_p5 = pnand %p797_p2, %p796_p1 }
  0x30   : > { %s704_s24 = sand.u32 (!%p133_p5), 1, %s561_s7  }
  0x31   : > { %136 = sbr.rel (%p133_p5) target bundleno = 143 (0x8f), region = 24  ;;  %s381_s25 = sshll.u32 (!%p133_p5), %s704_s24, 3 }
  0x32   : > { %s139_s26 = scalar_lea.sflag (!%p133_p5), [#allocation3], %s704_s24  ;;  %s142_s28 = scalar_lea.vmem (!%p133_p5), [#allocation2], %s381_s25 }
  0x38   : > { %548 = dma.done.wait (%p640_p8), %s139_s26, 128  }
  0x39   : > { %550 = vsyncadd (%p640_p8), %s139_s26, 4294967168  ;;  %s382_s27 = sshll.u32 %s704_s24, 1  ;;  %v168_v0 = vlaneseq  ;;  %v580_v2 = vmov 0.0   ;;  %vm178_vm1 = vcmask 1043456   ;;  %v173_v3 = vld [vmem:[%s142_s28] sm:$0xff]  ;;  %s389_s18 = sshll.u32 %s569_s9, 5 }
  0x3a   : > { %s718_s29 = scalar_lea.vmem [#allocation5], %s382_s27  ;;  %v176_v4 = vcombine.high %v173_v3, %v173_v3  ;;  %v179_v5 = vsel %vm178_vm1, %v173_v3, -inf  ;;  %v581_v53 = vmov 1966171168   ;;  %s736_s4 = scalar_lea.hbm %s789_s1, %s389_s18 }
  0x3b   : > { %vm714_vm0 = vcmp.lt.s32.totalorder %v168_v0, 256  ;;  %v180_v6 = vrot.slane %v179_v5, 4  ;;  %v251_v54 = vunpack.c.l.s4 %v581_v53  ;;  %v254_v62 = vshrl.u32 %v168_v0, 7  ;;  %s287_s30 = sshll.u32 %s718_s29, 4  ;;  %s272_s5 = scalar_lea.sflag [#allocation4], %s704_s24  ;;  %s738_s30 = int_to_ptr.vmem [resolvable:$true] %s287_s30 }
  0x3c   : > { %172 = vst.msk [vmem:[%s718_s29] sm:$0x3] %vm714_vm0, %v580_v2  ;;  %v186_v7 = vsel %vm178_vm1, %v176_v4, -inf  ;;  %s495_s12 = scalar_lea.vmem %s738_s30, 32  ;;  %p800_p9 = scmp.ne.s32.totalorder %s793_s19, 0 }
  0x3d   : > { %v181_v8 = vmax.f32 %v179_v5, %v180_v6  ;;  %v187_v9 = vrot.slane %v186_v7, 4  ;;  %v252_v61 = vunpack.c.0.s8 %v251_v54  ;;  %p496_p8 = scmp.ne.s32.totalorder %s738_s30, %s495_s12  ;;  %s582_s9 = smov [#allocation5]  }
  0x3e   : > { %s499_s13 = sshll.u32 %s582_s9, 4  ;;  %s500_s13 = int_to_ptr.vmem [resolvable:$false] %s499_s13 }
  0x3f   : > { %v182_v10 = vrot.slane %v181_v8, 2  ;;  %v188_v11 = vmax.f32 %v186_v7, %v187_v9  ;;  %v255_v6 = vsub.s32 %v252_v61, %v254_v62  ;;  %p497_p11 = pnand %p496_p8, %p800_p9  ;;  %s501_s15 = scalar_lea.vmem %s500_s13, 64 }
  0x40   : > { %p502_p7 = scmp.lt.s32.totalorder %s738_s30, %s500_s13  ;;  %p503_p13 = scmp.lt.s32.totalorder %s501_s15, %s495_s12 }
  0x41   : > { %v183_v12 = vmax.f32 %v181_v8, %v182_v10  ;;  %v189_v13 = vrot.slane %v188_v11, 2  ;;  %p498_p0 = pneg %p497_p11 }
  0x42   : > { %p504_p3 = por %p503_p13, %p502_p7 }
  0x43   : > { %v184_v14 = vrot.slane %v183_v12, 1  ;;  %v190_v15 = vmax.f32 %v188_v11, %v189_v13  ;;  %v174_v9 = vld [vmem:[%s718_s29] sm:$0x3] }
  0x44   : > { %p505_p6 = pnand %p504_p3, %p498_p0 }
  0x45   : > { %v185_v16 = vmax.f32 %v183_v12, %v184_v14  ;;  %v191_v17 = vrot.slane %v190_v15, 1 }
  0x47   : > { %v192_v18 = vmax.f32 %v190_v15, %v191_v17 }
  0x49   : > { %v195_v19 = vcombine.low %v185_v16, %v192_v18 }
  0x4b   : > { %v197_v20 = vsub.f32 %v173_v3, %v195_v19 }
  0x4d   : > { %v198_v21 = vmul.f32 1.442695, %v197_v20 }
  0x4f   : > { %455 = vpow2.f32 %v198_v21 }
  0x59   : > { %v456_v22 = vpop.eup %455 }
  0x5a   : > { %v201_v23 = vcombine.high %v456_v22, %v456_v22  ;;  %v203_v24 = vsel %vm178_vm1, %v456_v22, 0.0  ;;  %v217_v25 = vmul.f32 %v456_v22, %v197_v20 }
  0x5b   : > { %v204_v26 = vrot.slane %v203_v24, 4 }
  0x5c   : > { %v210_v27 = vsel %vm178_vm1, %v201_v23, 0.0  ;;  %v219_v28 = vcombine.high %v217_v25, %v217_v25  ;;  %v221_v29 = vsel %vm178_vm1, %v217_v25, 0.0 }
  0x5d   : > { %v205_v30 = vadd.f32 %v204_v26, %v203_v24  ;;  %v211_v31 = vrot.slane %v210_v27, 4  ;;  %v222_v32 = vrot.slane %v221_v29, 4 }
  0x5e   : > { %v228_v33 = vsel %vm178_vm1, %v219_v28, 0.0 }
  0x5f   : > { %v206_v34 = vrot.slane %v205_v30, 2  ;;  %v212_v35 = vadd.f32 %v211_v31, %v210_v27  ;;  %v223_v36 = vadd.f32 %v222_v32, %v221_v29  ;;  %v229_v37 = vrot.slane %v228_v33, 4 }
  0x61   : > { %v207_v38 = vadd.f32 %v206_v34, %v205_v30  ;;  %v213_v39 = vrot.slane %v212_v35, 2  ;;  %v230_v40 = vadd.f32 %v229_v37, %v228_v33  ;;  %v224_v43 = vrot.slane %v223_v36, 2 }
  0x63   : > { %v208_v41 = vrot.slane %v207_v38, 1  ;;  %v214_v42 = vadd.f32 %v213_v39, %v212_v35  ;;  %v231_v46 = vrot.slane %v230_v40, 2  ;;  %v225_v48 = vadd.f32 %v224_v43, %v223_v36 }
  0x65   : > { %v209_v44 = vadd.f32 %v208_v41, %v207_v38  ;;  %v215_v45 = vrot.slane %v214_v42, 1  ;;  %v232_v49 = vadd.f32 %v231_v46, %v230_v40  ;;  %v226_v50 = vrot.slane %v225_v48, 1 }
  0x67   : > { %v216_v47 = vadd.f32 %v215_v45, %v214_v42  ;;  %457 = vlog2.f32 %v209_v44  ;;  %v233_v51 = vrot.slane %v232_v49, 1  ;;  %v227_v52 = vadd.f32 %v226_v50, %v225_v48 }
  0x68   : > { %459 = vrcp.f32 %v209_v44 }
  0x69   : > { %461 = vlog2.f32 %v216_v47  ;;  %v234_v56 = vadd.f32 %v233_v51, %v232_v49 }
  0x6a   : > { %463 = vrcp.f32 %v216_v47 }
  0x71   : > { %v458_v55 = vpop.eup %457 }
  0x72   : > { %v460_v57 = vpop.eup %459  ;;  %v236_v58 = vmul.f32 0.6931472, %v458_v55 }
  0x73   : > { %v462_v59 = vpop.eup %461  ;;  %v240_v60 = vmul.f32 %v460_v57, %v227_v52 }
  0x74   : > { %v464_v63 = vpop.eup %463  ;;  %v238_v2 = vmul.f32 0.6931472, %v462_v59 }
  0x75   : > { %v242_v3 = vmul.f32 %v464_v63, %v234_v56  ;;  %v243_v4 = vsub.f32 %v236_v58, %v240_v60 }
  0x77   : > { %v244_v5 = vsub.f32 %v238_v2, %v242_v3 }
  0x79   : > { %v249_v7 = vcombine.low %v243_v4, %v244_v5 }
  0x7b   : > { %v256_v8 = vrot.slane %v249_v7, %v255_v6 }
  0x7d   : > { %v263_v10 = vrot.slane %v256_v8, %v255_v6 }
  0x7f   : > { %v265_v11 = vadd.f32 %v263_v10, %v174_v9 }
  0x81   : > { %270 = vst.msk [vmem:[%s718_s29] sm:$0x3] %vm714_vm0, %v265_v11 }
  0x82   : > { %508 = shalt.err (!%p505_p6)
}
  0x83   : > { %s509_s16 = scalar_lea.hbm %s736_s4, 32  ;;  %s513_s23 = scalar_lea.hbm %s789_s1, 64 }
  0x84   : > { %p510_p4 = scmp.ne.s32.totalorder %s736_s4, %s509_s16  ;;  %p514_p1 = scmp.lt.u32.totalorder %s736_s4, %s789_s1 }
  0x85   : > { %p515_p2 = scmp.lt.u32.totalorder %s513_s23, %s509_s16  ;;  %p517_p8 = scmp.lt.u32.totalorder %s509_s16, %s736_s4 }
  0x86   : > { %p511_p10 = pnand %p510_p4, %p800_p9 }
  0x87   : > { %p516_p5 = por %p515_p2, %p514_p1 }
  0x88   : > { %p512_p12 = pneg %p511_p10 }
  0x89   : > { %p518_p11 = por %p517_p8, %p516_p5 }
  0x8b   : > { %p519_p0 = pnand %p518_p11, %p512_p12 }
  0x8d   : > { %522 = shalt.err (!%p519_p0)
}
  0x8e   : > { %392 = dma.vmem_to_hbm [thread:$0]  (%p800_p9), %s738_s30, 32, %s736_s4, %s272_s5  }
  0x8f PF: > { %s299_s26 = sand.u32 1, %s557_s6   ;;  %p801_p7 = scmp.ne.s32.totalorder %s794_s21, 0 }
  0x90   : > { %p802_p13 = scmp.ge.s32.totalorder %s577_s11, 2  ;;  %s300_s28 = scalar_lea.sflag [#allocation4], %s299_s26 }
  0x92   : > { %p399_p3 = pnand %p802_p13, %p801_p7 }
  0x94   : > { %552 = dma.done.wait (!%p399_p3), %s300_s28, 32  }
  0x95   : > { %554 = vsyncadd (!%p399_p3), %s300_s28, 4294967264  ;;  %s17_s11 = sadd.s32 1, %s577_s11   ;;  %s803_s6 = smov %s561_s7 }
  0x96   : > { %p14_p6 = scmp.ge.s32.totalorder %s17_s11, 4   ;;  %s804_s7 = smov %s565_s8 }
  0x97   : > { %s805_s8 = smov %s649_s20  ;;  %s806_s9 = smov %s573_s10 }
  0x98   : > { %s807_s10 = smov %s809_s14  ;;  %16 = sbr.rel (!%p14_p6) target bundleno = 6 (0x6), region = 73 }
  0x9f   :  { %305 = vsyncpa [#allocation3], 1 }
  0xa0   :  { %307 = vsyncpa [#allocation3 + $0x1], 1 }
  0xa1   :  { %308 = vsyncpa [#allocation4], 1 }
  0xa2   :  { %310 = vsyncpa [#allocation4 + $0x1], 1 }

</bundles_post_ra>
